<compile_context>
chip_gen: v5e
topology: v5e:2x2
jax: 0.10.0
libtpu: 0.0.40
codegen_flags: <defaults>
</compile_context>

<pallas_src>
import numpy as np
import jax
import jax.numpy as jnp
from jax.experimental import pallas as pl
from jax.experimental.pallas import tpu as pltpu


# ---------------------------------------------------------------------------
# Fused kernel (one grid step == one image; everything stays in VMEM)
# ---------------------------------------------------------------------------
def _make_kernel(num_blocks, ho_list):
    """Ref layout:
       inputs : [x, (band, shift, row_sel, col_sel) * num_blocks, dense_blocks, bias]
       outputs: [o]
       scratch: [act_0, ..., act_{num_blocks-1}]  (per-block pooled activations)"""

    def kernel(*refs):
        wd_ref = refs[1 + 4 * num_blocks]      # (Hf, Wf*Cf, O)
        bias_ref = refs[2 + 4 * num_blocks]    # (1, O)
        o_ref = refs[3 + 4 * num_blocks]       # (1, O)
        act = refs[4 + 4 * num_blocks:]        # VMEM scratch, one per block

        cur = refs[0]                          # (H, W*Cin) image slab (ref)
        for b in range(num_blocks):            # static unroll
            wb_ref, sh_ref, rs_ref, cs_ref = refs[1 + 4 * b: 5 + 4 * b]
            ho = ho_list[b]
            # Conv2d(3x3, no bias) with BN-scale folded into the weights:
            # 3 banded matmuls (implicit im2col), f32 accumulation on the MXU.
            acc = jnp.dot(cur[0:ho, :], wb_ref[0], preferred_element_type=jnp.float32)
            acc = acc + jnp.dot(cur[1:ho + 1, :], wb_ref[1], preferred_element_type=jnp.float32)
            acc = acc + jnp.dot(cur[2:ho + 2, :], wb_ref[2], preferred_element_type=jnp.float32)
            # MaxPool2d(2): rows then (W,C)-columns via constant 0/1 selection
            # matmuls (pure selection -> commutes with the monotone shift+ReLU).
            v = jnp.maximum(
                jnp.dot(rs_ref[0], acc, preferred_element_type=jnp.float32),
                jnp.dot(rs_ref[1], acc, preferred_element_type=jnp.float32))
            p = jnp.maximum(
                jnp.dot(v, cs_ref[0], preferred_element_type=jnp.float32),
                jnp.dot(v, cs_ref[1], preferred_element_type=jnp.float32))
            # BN shift + ReLU on the pooled (4x smaller) tensor.
            # Dropout(p=0.3) is identity at eval.
            act[b][...] = jnp.maximum(p + sh_ref[...], 0.0)
            cur = act[b]                       # stays in VMEM

        # Flatten (NCHW ordering baked into wd blocks) + Linear.
        out = bias_ref[...]
        for hh in range(wd_ref.shape[0]):      # static unroll (final H is tiny)
            out = out + jnp.dot(cur[hh:hh + 1, :], wd_ref[hh],
                                preferred_element_type=jnp.float32)
        o_ref[...] = out.astype(o_ref.dtype)

    return kernel


# ---------------------------------------------------------------------------
# Parameter-only constant preparation (wrapper-side glue)
# ---------------------------------------------------------------------------
def _conv_block_constants(w_oihw, scale, shift, h, w):
    """Constants for one conv block in the per-image (H, W*C) layout."""
    cout, cin, kh, kw = w_oihw.shape
    ho, wo = h - 2, w - 2
    hp, wp = ho // 2, wo // 2

    # Fold the BN scale into the conv weights (per output channel).
    w_scaled = w_oihw * scale[:, None, None, None]

    # Banded conv weights: band[r, x*cin+ci, j*cout+co] = Ws[co, ci, r, x - j]
    ind = np.zeros((w, kw, wo), np.float32)
    for j in range(wo):
        for k in range(kw):
            ind[j + k, k, j] = 1.0
    wt = jnp.transpose(w_scaled, (2, 3, 1, 0))                      # (kh, kw, ci, co)
    band = (jnp.asarray(ind)[None, :, :, None, :, None] *
            wt[:, None, :, :, None, :]).sum(axis=2)                 # (kh, w, ci, wo, co)
    band = band.reshape(kh, w * cin, wo * cout)

    # BN shift pre-tiled along the pooled W*C lane axis (applied post-pool).
    shift_tiled = jnp.tile(shift, wp).reshape(1, wp * cout)

    # 2x2 max-pool selection matrices (even/odd rows, even/odd W-column blocks).
    rs = np.zeros((2, hp, ho), np.float32)
    for i in range(hp):
        rs[0, i, 2 * i] = 1.0
        rs[1, i, 2 * i + 1] = 1.0
    cs = np.zeros((2, wo * cout, wp * cout), np.float32)
    for j in range(wp):
        for c in range(cout):
            cs[0, (2 * j) * cout + c, j * cout + c] = 1.0
            cs[1, (2 * j + 1) * cout + c, j * cout + c] = 1.0

    return band, shift_tiled, jnp.asarray(rs), jnp.asarray(cs), (ho, hp, wp, cout)


def base_classifier_forward(params, x_nchw, cfg):
    n, cin, h, w = x_nchw.shape
    num_blocks = cfg['num_conv_blocks']
    n_out = cfg['out_classes']

    # Input glue: NCHW -> per-image (H, W*C) channels-last rows (lane-dense).
    x2d = jnp.transpose(x_nchw, (0, 2, 3, 1)).reshape(n, h, w * cin)
    inputs = [x2d]
    in_specs = [pl.BlockSpec((None, h, w * cin), lambda i: (i, 0, 0))]

    def _const_spec(arr):
        nd = arr.ndim
        return pl.BlockSpec(arr.shape, lambda i, _nd=nd: (0,) * _nd)

    ho_list, scratch_shapes = [], []
    for b in range(num_blocks):
        w_oihw, scale, shift = params['convs'][b]
        band, shift_tiled, rs, cs, (ho, hp, wp, cout) = _conv_block_constants(
            w_oihw, scale, shift, h, w)
        ho_list.append(ho)
        for arr in (band, shift_tiled, rs, cs):
            inputs.append(arr)
            in_specs.append(_const_spec(arr))
        scratch_shapes.append(pltpu.VMEM((hp, wp * cout), jnp.float32))
        h, w, cin = hp, wp, cout

    assert cfg['base_in_features'] == cin * h * w
    # Dense weight re-ordered into per-row blocks matching the (h, w*c) layout,
    # reproducing nn.Flatten's NCHW ordering exactly.
    wd = params['dense_w'].reshape(n_out, cin, h, w)
    wd_blocks = jnp.transpose(wd, (2, 3, 1, 0)).reshape(h, w * cin, n_out)
    bias = params['dense_b'].reshape(1, n_out)
    for arr in (wd_blocks, bias):
        inputs.append(arr)
        in_specs.append(_const_spec(arr))

    out = pl.pallas_call(
        _make_kernel(num_blocks, tuple(ho_list)),
        out_shape=jax.ShapeDtypeStruct((n, 1, n_out), jnp.float32),
        grid=(n,),
        in_specs=in_specs,
        out_specs=pl.BlockSpec((None, 1, n_out), lambda i: (i, 0, 0)),
        scratch_shapes=scratch_shapes,
        compiler_params=pltpu.CompilerParams(
            dimension_semantics=("parallel",)),   # batch across v7x TensorCores
    )(*inputs)
    return out.reshape(n, n_out)


# ---------------------------------------------------------------------------
# Model params (torch-layout weights, BN folded to per-channel affine) + ref
# ---------------------------------------------------------------------------
def init_params(cfg, key):
    params = {'convs': []}
    eps = 1e-5
    for i in range(cfg['num_conv_blocks']):
        cin = cfg['in_channels'] if i == 0 else cfg['channels'][i][0]
        cout = cfg['channels'][i][1]
        key, k1, k2, k3, k4, k5 = jax.random.split(key, 6)
        wgt = 0.1 * jax.random.normal(k1, (cout, cin, 3, 3), jnp.float32)   # OIHW
        gamma = 1.0 + 0.1 * jax.random.normal(k2, (cout,), jnp.float32)
        beta = 0.1 * jax.random.normal(k3, (cout,), jnp.float32)
        mean = 0.1 * jax.random.normal(k4, (cout,), jnp.float32)
        var = jnp.abs(jax.random.normal(k5, (cout,), jnp.float32)) + 0.5
        scale = gamma / jnp.sqrt(var + eps)
        shift = beta - mean * scale
        params['convs'].append((wgt, scale, shift))
    key, kw, kb = jax.random.split(key, 3)
    params['dense_w'] = 0.05 * jax.random.normal(
        kw, (cfg['out_classes'], cfg['base_in_features']), jnp.float32)     # (out, in)
    params['dense_b'] = 0.01 * jax.random.normal(kb, (cfg['out_classes'],), jnp.float32)
    return params


def reference_forward(params, x_nchw):
    """Pure-JAX reference (same eval semantics) for the in-script check."""
    x = x_nchw
    for (wc, scale, shift) in params['convs']:
        x = jax.lax.conv_general_dilated(
            x, wc, window_strides=(1, 1), padding='VALID',
            dimension_numbers=('NCHW', 'OIHW', 'NCHW'))
        x = x * scale[None, :, None, None] + shift[None, :, None, None]
        x = jnp.maximum(x, 0.0)
        x = jax.lax.reduce_window(x, -jnp.inf, jax.lax.max,
                                  (1, 1, 2, 2), (1, 1, 2, 2), 'VALID')
    feat = x.reshape(x.shape[0], -1)
    return feat @ params['dense_w'].T + params['dense_b'][None, :]


if __name__ == "__main__":
    cfg = {
        'num_conv_blocks': 2,
        'in_channels': 4,
        'channels': [(4, 8), (8, 16)],
        # 16x16 -> conv 14x14 -> pool 7x7 -> conv 5x5 -> pool 2x2 ; 16*2*2 = 64
        'base_in_features': 64,
        'out_classes': 10,
    }
    key = jax.random.PRNGKey(0)
    kx, kp = jax.random.split(key)
    x = jax.random.normal(kx, (2, cfg['in_channels'], 16, 16), jnp.float32)
    params = init_params(cfg, kp)

    fwd = jax.jit(lambda p, xx: base_classifier_forward(p, xx, cfg))
    out = jax.block_until_ready(fwd(params, x))
    assert out.shape == (2, cfg['out_classes'])
    assert out.dtype == jnp.float32

    ref = jax.block_until_ready(reference_forward(params, x))
    np.testing.assert_allclose(np.asarray(out), np.asarray(ref), rtol=5e-2, atol=5e-2)
    print("KERNEL_OK")
</pallas_src>

<mosaic_0001>
module attributes {stable_mosaic.version = 11 : i64} {
  func.func @kernel(%arg0: i32, %arg1: memref<1x16x64xf32, #tpu.memory_space<vmem>>, %arg2: memref<3x64x112xf32, #tpu.memory_space<vmem>>, %arg3: memref<1x56xf32, #tpu.memory_space<vmem>>, %arg4: memref<2x7x14xf32, #tpu.memory_space<vmem>>, %arg5: memref<2x112x56xf32, #tpu.memory_space<vmem>>, %arg6: memref<3x56x80xf32, #tpu.memory_space<vmem>>, %arg7: memref<1x32xf32, #tpu.memory_space<vmem>>, %arg8: memref<2x2x5xf32, #tpu.memory_space<vmem>>, %arg9: memref<2x80x32xf32, #tpu.memory_space<vmem>>, %arg10: memref<2x32x10xf32, #tpu.memory_space<vmem>>, %arg11: memref<1x10xf32, #tpu.memory_space<vmem>>, %arg12: memref<1x1x10xf32, #tpu.memory_space<vmem>>, %arg13: memref<7x56xf32, #tpu.memory_space<vmem>>, %arg14: memref<2x32xf32, #tpu.memory_space<vmem>>) attributes {dimension_semantics = [#tpu.dimension_semantics<parallel>], iteration_bounds = array<i64: 2>, scalar_prefetch = 0 : i64, scratch_operands = 2 : i64, tpu.core_type = #tpu.core_type<tc>, window_params = [{transform_indices = @transform_0, window_bounds = array<i64: 1, 16, 64>}, {pipeline_mode = #tpu.pipeline_mode<synchronous>, transform_indices = @transform_1, window_bounds = array<i64: 3, 64, 112>}, {pipeline_mode = #tpu.pipeline_mode<synchronous>, transform_indices = @transform_2, window_bounds = array<i64: 1, 56>}, {pipeline_mode = #tpu.pipeline_mode<synchronous>, transform_indices = @transform_3, window_bounds = array<i64: 2, 7, 14>}, {pipeline_mode = #tpu.pipeline_mode<synchronous>, transform_indices = @transform_4, window_bounds = array<i64: 2, 112, 56>}, {pipeline_mode = #tpu.pipeline_mode<synchronous>, transform_indices = @transform_5, window_bounds = array<i64: 3, 56, 80>}, {pipeline_mode = #tpu.pipeline_mode<synchronous>, transform_indices = @transform_6, window_bounds = array<i64: 1, 32>}, {pipeline_mode = #tpu.pipeline_mode<synchronous>, transform_indices = @transform_7, window_bounds = array<i64: 2, 2, 5>}, {pipeline_mode = #tpu.pipeline_mode<synchronous>, transform_indices = @transform_8, window_bounds = array<i64: 2, 80, 32>}, {pipeline_mode = #tpu.pipeline_mode<synchronous>, transform_indices = @transform_9, window_bounds = array<i64: 2, 32, 10>}, {pipeline_mode = #tpu.pipeline_mode<synchronous>, transform_indices = @transform_10, window_bounds = array<i64: 1, 10>}, {transform_indices = @transform_11, window_bounds = array<i64: 1, 1, 10>}]} {
    %c0 = arith.constant 0 : index
    %c0_0 = arith.constant 0 : index
    %c0_1 = arith.constant 0 : index
    %0 = vector.load %arg1[%c0, %c0_0, %c0_1] : memref<1x16x64xf32, #tpu.memory_space<vmem>>, vector<1x14x64xf32>
    %1 = vector.shape_cast %0 : vector<1x14x64xf32> to vector<14x64xf32>
    %c0_2 = arith.constant 0 : index
    %c0_3 = arith.constant 0 : index
    %c0_4 = arith.constant 0 : index
    %2 = vector.load %arg2[%c0_2, %c0_3, %c0_4] : memref<3x64x112xf32, #tpu.memory_space<vmem>>, vector<1x64x112xf32>
    %3 = vector.shape_cast %2 : vector<1x64x112xf32> to vector<64x112xf32>
    %cst = arith.constant dense<0.000000e+00> : vector<14x112xf32>
    %4 = tpu.matmul %1, %3, %cst {dimension_numbers = #tpu.dot_dimension_numbers<[1], [0], [0], [1], [0, 0, 1, 1], [], []>} : vector<14x64xf32>, vector<64x112xf32>, vector<14x112xf32> -> vector<14x112xf32>
    %c0_5 = arith.constant 0 : index
    %c1 = arith.constant 1 : index
    %c0_6 = arith.constant 0 : index
    %5 = vector.load %arg1[%c0_5, %c1, %c0_6] : memref<1x16x64xf32, #tpu.memory_space<vmem>>, vector<1x14x64xf32>
    %6 = vector.shape_cast %5 : vector<1x14x64xf32> to vector<14x64xf32>
    %c1_7 = arith.constant 1 : index
    %c0_8 = arith.constant 0 : index
    %c0_9 = arith.constant 0 : index
    %7 = vector.load %arg2[%c1_7, %c0_8, %c0_9] : memref<3x64x112xf32, #tpu.memory_space<vmem>>, vector<1x64x112xf32>
    %8 = vector.shape_cast %7 : vector<1x64x112xf32> to vector<64x112xf32>
    %cst_10 = arith.constant dense<0.000000e+00> : vector<14x112xf32>
    %9 = tpu.matmul %6, %8, %cst_10 {dimension_numbers = #tpu.dot_dimension_numbers<[1], [0], [0], [1], [0, 0, 1, 1], [], []>} : vector<14x64xf32>, vector<64x112xf32>, vector<14x112xf32> -> vector<14x112xf32>
    %10 = arith.addf %4, %9 : vector<14x112xf32>
    %c0_11 = arith.constant 0 : index
    %c2 = arith.constant 2 : index
    %c0_12 = arith.constant 0 : index
    %11 = vector.load %arg1[%c0_11, %c2, %c0_12] : memref<1x16x64xf32, #tpu.memory_space<vmem>>, vector<1x14x64xf32>
    %12 = vector.shape_cast %11 : vector<1x14x64xf32> to vector<14x64xf32>
    %c2_13 = arith.constant 2 : index
    %c0_14 = arith.constant 0 : index
    %c0_15 = arith.constant 0 : index
    %13 = vector.load %arg2[%c2_13, %c0_14, %c0_15] : memref<3x64x112xf32, #tpu.memory_space<vmem>>, vector<1x64x112xf32>
    %14 = vector.shape_cast %13 : vector<1x64x112xf32> to vector<64x112xf32>
    %cst_16 = arith.constant dense<0.000000e+00> : vector<14x112xf32>
    %15 = tpu.matmul %12, %14, %cst_16 {dimension_numbers = #tpu.dot_dimension_numbers<[1], [0], [0], [1], [0, 0, 1, 1], [], []>} : vector<14x64xf32>, vector<64x112xf32>, vector<14x112xf32> -> vector<14x112xf32>
    %16 = arith.addf %10, %15 : vector<14x112xf32>
    %c0_17 = arith.constant 0 : index
    %c0_18 = arith.constant 0 : index
    %c0_19 = arith.constant 0 : index
    %17 = vector.load %arg4[%c0_17, %c0_18, %c0_19] : memref<2x7x14xf32, #tpu.memory_space<vmem>>, vector<1x7x14xf32>
    %18 = vector.shape_cast %17 : vector<1x7x14xf32> to vector<7x14xf32>
    %cst_20 = arith.constant dense<0.000000e+00> : vector<7x112xf32>
    %19 = tpu.matmul %18, %16, %cst_20 {dimension_numbers = #tpu.dot_dimension_numbers<[1], [0], [0], [1], [0, 0, 1, 1], [], []>} : vector<7x14xf32>, vector<14x112xf32>, vector<7x112xf32> -> vector<7x112xf32>
    %c1_21 = arith.constant 1 : index
    %c0_22 = arith.constant 0 : index
    %c0_23 = arith.constant 0 : index
    %20 = vector.load %arg4[%c1_21, %c0_22, %c0_23] : memref<2x7x14xf32, #tpu.memory_space<vmem>>, vector<1x7x14xf32>
    %21 = vector.shape_cast %20 : vector<1x7x14xf32> to vector<7x14xf32>
    %cst_24 = arith.constant dense<0.000000e+00> : vector<7x112xf32>
    %22 = tpu.matmul %21, %16, %cst_24 {dimension_numbers = #tpu.dot_dimension_numbers<[1], [0], [0], [1], [0, 0, 1, 1], [], []>} : vector<7x14xf32>, vector<14x112xf32>, vector<7x112xf32> -> vector<7x112xf32>
    %23 = arith.maximumf %19, %22 : vector<7x112xf32>
    %c0_25 = arith.constant 0 : index
    %c0_26 = arith.constant 0 : index
    %c0_27 = arith.constant 0 : index
    %24 = vector.load %arg5[%c0_25, %c0_26, %c0_27] : memref<2x112x56xf32, #tpu.memory_space<vmem>>, vector<1x112x56xf32>
    %25 = vector.shape_cast %24 : vector<1x112x56xf32> to vector<112x56xf32>
    %cst_28 = arith.constant dense<0.000000e+00> : vector<7x56xf32>
    %26 = tpu.matmul %23, %25, %cst_28 {dimension_numbers = #tpu.dot_dimension_numbers<[1], [0], [0], [1], [0, 0, 1, 1], [], []>} : vector<7x112xf32>, vector<112x56xf32>, vector<7x56xf32> -> vector<7x56xf32>
    %c1_29 = arith.constant 1 : index
    %c0_30 = arith.constant 0 : index
    %c0_31 = arith.constant 0 : index
    %27 = vector.load %arg5[%c1_29, %c0_30, %c0_31] : memref<2x112x56xf32, #tpu.memory_space<vmem>>, vector<1x112x56xf32>
    %28 = vector.shape_cast %27 : vector<1x112x56xf32> to vector<112x56xf32>
    %cst_32 = arith.constant dense<0.000000e+00> : vector<7x56xf32>
    %29 = tpu.matmul %23, %28, %cst_32 {dimension_numbers = #tpu.dot_dimension_numbers<[1], [0], [0], [1], [0, 0, 1, 1], [], []>} : vector<7x112xf32>, vector<112x56xf32>, vector<7x56xf32> -> vector<7x56xf32>
    %30 = arith.maximumf %26, %29 : vector<7x56xf32>
    %c0_33 = arith.constant 0 : index
    %c0_34 = arith.constant 0 : index
    %31 = vector.load %arg3[%c0_33, %c0_34] : memref<1x56xf32, #tpu.memory_space<vmem>>, vector<1x56xf32>
    %32 = vector.broadcast %31 : vector<1x56xf32> to vector<7x56xf32>
    %33 = arith.addf %30, %32 : vector<7x56xf32>
    %cst_35 = arith.constant 0.000000e+00 : f32
    %34 = vector.broadcast %cst_35 : f32 to vector<7x56xf32>
    %35 = arith.maximumf %33, %34 : vector<7x56xf32>
    %c0_36 = arith.constant 0 : index
    %c0_37 = arith.constant 0 : index
    %36 = vector.load %arg13[%c0_36, %c0_37] : memref<7x56xf32, #tpu.memory_space<vmem>>, vector<7x56xf32>
    tpu.vector_store %arg13[%c0_36, %c0_37], %35 {strides = array<i32>} : memref<7x56xf32, #tpu.memory_space<vmem>>, vector<7x56xf32>,
    %c0_38 = arith.constant 0 : index
    %c0_39 = arith.constant 0 : index
    %37 = vector.load %arg13[%c0_38, %c0_39] : memref<7x56xf32, #tpu.memory_space<vmem>>, vector<5x56xf32>
    %c0_40 = arith.constant 0 : index
    %c0_41 = arith.constant 0 : index
    %c0_42 = arith.constant 0 : index
    %38 = vector.load %arg6[%c0_40, %c0_41, %c0_42] : memref<3x56x80xf32, #tpu.memory_space<vmem>>, vector<1x56x80xf32>
    %39 = vector.shape_cast %38 : vector<1x56x80xf32> to vector<56x80xf32>
    %cst_43 = arith.constant dense<0.000000e+00> : vector<5x80xf32>
    %40 = tpu.matmul %37, %39, %cst_43 {dimension_numbers = #tpu.dot_dimension_numbers<[1], [0], [0], [1], [0, 0, 1, 1], [], []>} : vector<5x56xf32>, vector<56x80xf32>, vector<5x80xf32> -> vector<5x80xf32>
    %c1_44 = arith.constant 1 : index
    %c0_45 = arith.constant 0 : index
    %41 = vector.load %arg13[%c1_44, %c0_45] : memref<7x56xf32, #tpu.memory_space<vmem>>, vector<5x56xf32>
    %c1_46 = arith.constant 1 : index
    %c0_47 = arith.constant 0 : index
    %c0_48 = arith.constant 0 : index
    %42 = vector.load %arg6[%c1_46, %c0_47, %c0_48] : memref<3x56x80xf32, #tpu.memory_space<vmem>>, vector<1x56x80xf32>
    %43 = vector.shape_cast %42 : vector<1x56x80xf32> to vector<56x80xf32>
    %cst_49 = arith.constant dense<0.000000e+00> : vector<5x80xf32>
    %44 = tpu.matmul %41, %43, %cst_49 {dimension_numbers = #tpu.dot_dimension_numbers<[1], [0], [0], [1], [0, 0, 1, 1], [], []>} : vector<5x56xf32>, vector<56x80xf32>, vector<5x80xf32> -> vector<5x80xf32>
    %45 = arith.addf %40, %44 : vector<5x80xf32>
    %c2_50 = arith.constant 2 : index
    %c0_51 = arith.constant 0 : index
    %46 = vector.load %arg13[%c2_50, %c0_51] : memref<7x56xf32, #tpu.memory_space<vmem>>, vector<5x56xf32>
    %c2_52 = arith.constant 2 : index
    %c0_53 = arith.constant 0 : index
    %c0_54 = arith.constant 0 : index
    %47 = vector.load %arg6[%c2_52, %c0_53, %c0_54] : memref<3x56x80xf32, #tpu.memory_space<vmem>>, vector<1x56x80xf32>
    %48 = vector.shape_cast %47 : vector<1x56x80xf32> to vector<56x80xf32>
    %cst_55 = arith.constant dense<0.000000e+00> : vector<5x80xf32>
    %49 = tpu.matmul %46, %48, %cst_55 {dimension_numbers = #tpu.dot_dimension_numbers<[1], [0], [0], [1], [0, 0, 1, 1], [], []>} : vector<5x56xf32>, vector<56x80xf32>, vector<5x80xf32> -> vector<5x80xf32>
    %50 = arith.addf %45, %49 : vector<5x80xf32>
    %c0_56 = arith.constant 0 : index
    %c0_57 = arith.constant 0 : index
    %c0_58 = arith.constant 0 : index
    %51 = vector.load %arg8[%c0_56, %c0_57, %c0_58] : memref<2x2x5xf32, #tpu.memory_space<vmem>>, vector<1x2x5xf32>
    %52 = vector.shape_cast %51 : vector<1x2x5xf32> to vector<2x5xf32>
    %cst_59 = arith.constant dense<0.000000e+00> : vector<2x80xf32>
    %53 = tpu.matmul %52, %50, %cst_59 {dimension_numbers = #tpu.dot_dimension_numbers<[1], [0], [0], [1], [0, 0, 1, 1], [], []>} : vector<2x5xf32>, vector<5x80xf32>, vector<2x80xf32> -> vector<2x80xf32>
    %c1_60 = arith.constant 1 : index
    %c0_61 = arith.constant 0 : index
    %c0_62 = arith.constant 0 : index
    %54 = vector.load %arg8[%c1_60, %c0_61, %c0_62] : memref<2x2x5xf32, #tpu.memory_space<vmem>>, vector<1x2x5xf32>
    %55 = vector.shape_cast %54 : vector<1x2x5xf32> to vector<2x5xf32>
    %cst_63 = arith.constant dense<0.000000e+00> : vector<2x80xf32>
    %56 = tpu.matmul %55, %50, %cst_63 {dimension_numbers = #tpu.dot_dimension_numbers<[1], [0], [0], [1], [0, 0, 1, 1], [], []>} : vector<2x5xf32>, vector<5x80xf32>, vector<2x80xf32> -> vector<2x80xf32>
    %57 = arith.maximumf %53, %56 : vector<2x80xf32>
    %c0_64 = arith.constant 0 : index
    %c0_65 = arith.constant 0 : index
    %c0_66 = arith.constant 0 : index
    %58 = vector.load %arg9[%c0_64, %c0_65, %c0_66] : memref<2x80x32xf32, #tpu.memory_space<vmem>>, vector<1x80x32xf32>
    %59 = vector.shape_cast %58 : vector<1x80x32xf32> to vector<80x32xf32>
    %cst_67 = arith.constant dense<0.000000e+00> : vector<2x32xf32>
    %60 = tpu.matmul %57, %59, %cst_67 {dimension_numbers = #tpu.dot_dimension_numbers<[1], [0], [0], [1], [0, 0, 1, 1], [], []>} : vector<2x80xf32>, vector<80x32xf32>, vector<2x32xf32> -> vector<2x32xf32>
    %c1_68 = arith.constant 1 : index
    %c0_69 = arith.constant 0 : index
    %c0_70 = arith.constant 0 : index
    %61 = vector.load %arg9[%c1_68, %c0_69, %c0_70] : memref<2x80x32xf32, #tpu.memory_space<vmem>>, vector<1x80x32xf32>
    %62 = vector.shape_cast %61 : vector<1x80x32xf32> to vector<80x32xf32>
    %cst_71 = arith.constant dense<0.000000e+00> : vector<2x32xf32>
    %63 = tpu.matmul %57, %62, %cst_71 {dimension_numbers = #tpu.dot_dimension_numbers<[1], [0], [0], [1], [0, 0, 1, 1], [], []>} : vector<2x80xf32>, vector<80x32xf32>, vector<2x32xf32> -> vector<2x32xf32>
    %64 = arith.maximumf %60, %63 : vector<2x32xf32>
    %c0_72 = arith.constant 0 : index
    %c0_73 = arith.constant 0 : index
    %65 = vector.load %arg7[%c0_72, %c0_73] : memref<1x32xf32, #tpu.memory_space<vmem>>, vector<1x32xf32>
    %66 = vector.broadcast %65 : vector<1x32xf32> to vector<2x32xf32>
    %67 = arith.addf %64, %66 : vector<2x32xf32>
    %cst_74 = arith.constant 0.000000e+00 : f32
    %68 = vector.broadcast %cst_74 : f32 to vector<2x32xf32>
    %69 = arith.maximumf %67, %68 : vector<2x32xf32>
    %c0_75 = arith.constant 0 : index
    %c0_76 = arith.constant 0 : index
    %70 = vector.load %arg14[%c0_75, %c0_76] : memref<2x32xf32, #tpu.memory_space<vmem>>, vector<2x32xf32>
    tpu.vector_store %arg14[%c0_75, %c0_76], %69 {strides = array<i32>} : memref<2x32xf32, #tpu.memory_space<vmem>>, vector<2x32xf32>,
    %c0_77 = arith.constant 0 : index
    %c0_78 = arith.constant 0 : index
    %71 = vector.load %arg11[%c0_77, %c0_78] : memref<1x10xf32, #tpu.memory_space<vmem>>, vector<1x10xf32>
    %c0_79 = arith.constant 0 : index
    %c0_80 = arith.constant 0 : index
    %72 = vector.load %arg14[%c0_79, %c0_80] : memref<2x32xf32, #tpu.memory_space<vmem>>, vector<1x32xf32>
    %c0_81 = arith.constant 0 : index
    %c0_82 = arith.constant 0 : index
    %c0_83 = arith.constant 0 : index
    %73 = vector.load %arg10[%c0_81, %c0_82, %c0_83] : memref<2x32x10xf32, #tpu.memory_space<vmem>>, vector<1x32x10xf32>
    %74 = vector.shape_cast %73 : vector<1x32x10xf32> to vector<32x10xf32>
    %cst_84 = arith.constant dense<0.000000e+00> : vector<1x10xf32>
    %75 = tpu.matmul %72, %74, %cst_84 {dimension_numbers = #tpu.dot_dimension_numbers<[1], [0], [0], [1], [0, 0, 1, 1], [], []>} : vector<1x32xf32>, vector<32x10xf32>, vector<1x10xf32> -> vector<1x10xf32>
    %76 = arith.addf %71, %75 : vector<1x10xf32>
    %c1_85 = arith.constant 1 : index
    %c0_86 = arith.constant 0 : index
    %77 = vector.load %arg14[%c1_85, %c0_86] : memref<2x32xf32, #tpu.memory_space<vmem>>, vector<1x32xf32>
    %c1_87 = arith.constant 1 : index
    %c0_88 = arith.constant 0 : index
    %c0_89 = arith.constant 0 : index
    %78 = vector.load %arg10[%c1_87, %c0_88, %c0_89] : memref<2x32x10xf32, #tpu.memory_space<vmem>>, vector<1x32x10xf32>
    %79 = vector.shape_cast %78 : vector<1x32x10xf32> to vector<32x10xf32>
    %cst_90 = arith.constant dense<0.000000e+00> : vector<1x10xf32>
    %80 = tpu.matmul %77, %79, %cst_90 {dimension_numbers = #tpu.dot_dimension_numbers<[1], [0], [0], [1], [0, 0, 1, 1], [], []>} : vector<1x32xf32>, vector<32x10xf32>, vector<1x10xf32> -> vector<1x10xf32>
    %81 = arith.addf %76, %80 : vector<1x10xf32>
    %c0_91 = arith.constant 0 : index
    %c0_92 = arith.constant 0 : index
    %c0_93 = arith.constant 0 : index
    %82 = vector.load %arg12[%c0_91, %c0_92, %c0_93] : memref<1x1x10xf32, #tpu.memory_space<vmem>>, vector<1x1x10xf32>
    %83 = vector.shape_cast %82 : vector<1x1x10xf32> to vector<1x10xf32>
    %84 = vector.shape_cast %81 : vector<1x10xf32> to vector<1x1x10xf32>
    tpu.vector_store %arg12[%c0_91, %c0_92, %c0_93], %84 {strides = array<i32>} : memref<1x1x10xf32, #tpu.memory_space<vmem>>, vector<1x1x10xf32>,
    return
  }
  func.func @transform_0(%arg0: i32) -> (i32, i32, i32) {
    %c0_i32 = arith.constant 0 : i32
    %c0_i32_0 = arith.constant 0 : i32
    %c0_i32_1 = arith.constant 0 : i32
    return %arg0, %c0_i32, %c0_i32_0 : i32, i32, i32
  }
  func.func @transform_1(%arg0: i32) -> (i32, i32, i32) {
    %c0_i32 = arith.constant 0 : i32
    %c0_i32_0 = arith.constant 0 : i32
    %c0_i32_1 = arith.constant 0 : i32
    %c0_i32_2 = arith.constant 0 : i32
    return %c0_i32, %c0_i32_0, %c0_i32_1 : i32, i32, i32
  }
  func.func @transform_2(%arg0: i32) -> (i32, i32) {
    %c0_i32 = arith.constant 0 : i32
    %c0_i32_0 = arith.constant 0 : i32
    %c0_i32_1 = arith.constant 0 : i32
    return %c0_i32, %c0_i32_0 : i32, i32
  }
  func.func @transform_3(%arg0: i32) -> (i32, i32, i32) {
    %c0_i32 = arith.constant 0 : i32
    %c0_i32_0 = arith.constant 0 : i32
    %c0_i32_1 = arith.constant 0 : i32
    %c0_i32_2 = arith.constant 0 : i32
    return %c0_i32, %c0_i32_0, %c0_i32_1 : i32, i32, i32
  }
  func.func @transform_4(%arg0: i32) -> (i32, i32, i32) {
    %c0_i32 = arith.constant 0 : i32
    %c0_i32_0 = arith.constant 0 : i32
    %c0_i32_1 = arith.constant 0 : i32
    %c0_i32_2 = arith.constant 0 : i32
    return %c0_i32, %c0_i32_0, %c0_i32_1 : i32, i32, i32
  }
  func.func @transform_5(%arg0: i32) -> (i32, i32, i32) {
    %c0_i32 = arith.constant 0 : i32
    %c0_i32_0 = arith.constant 0 : i32
    %c0_i32_1 = arith.constant 0 : i32
    %c0_i32_2 = arith.constant 0 : i32
    return %c0_i32, %c0_i32_0, %c0_i32_1 : i32, i32, i32
  }
  func.func @transform_6(%arg0: i32) -> (i32, i32) {
    %c0_i32 = arith.constant 0 : i32
    %c0_i32_0 = arith.constant 0 : i32
    %c0_i32_1 = arith.constant 0 : i32
    return %c0_i32, %c0_i32_0 : i32, i32
  }
  func.func @transform_7(%arg0: i32) -> (i32, i32, i32) {
    %c0_i32 = arith.constant 0 : i32
    %c0_i32_0 = arith.constant 0 : i32
    %c0_i32_1 = arith.constant 0 : i32
    %c0_i32_2 = arith.constant 0 : i32
    return %c0_i32, %c0_i32_0, %c0_i32_1 : i32, i32, i32
  }
  func.func @transform_8(%arg0: i32) -> (i32, i32, i32) {
    %c0_i32 = arith.constant 0 : i32
    %c0_i32_0 = arith.constant 0 : i32
    %c0_i32_1 = arith.constant 0 : i32
    %c0_i32_2 = arith.constant 0 : i32
    return %c0_i32, %c0_i32_0, %c0_i32_1 : i32, i32, i32
  }
  func.func @transform_9(%arg0: i32) -> (i32, i32, i32) {
    %c0_i32 = arith.constant 0 : i32
    %c0_i32_0 = arith.constant 0 : i32
    %c0_i32_1 = arith.constant 0 : i32
    %c0_i32_2 = arith.constant 0 : i32
    return %c0_i32, %c0_i32_0, %c0_i32_1 : i32, i32, i32
  }
  func.func @transform_10(%arg0: i32) -> (i32, i32) {
    %c0_i32 = arith.constant 0 : i32
    %c0_i32_0 = arith.constant 0 : i32
    %c0_i32_1 = arith.constant 0 : i32
    return %c0_i32, %c0_i32_0 : i32, i32
  }
  func.func @transform_11(%arg0: i32) -> (i32, i32, i32) {
    %c0_i32 = arith.constant 0 : i32
    %c0_i32_0 = arith.constant 0 : i32
    %c0_i32_1 = arith.constant 0 : i32
    return %arg0, %c0_i32, %c0_i32_0 : i32, i32, i32
  }
}

</mosaic_0001>

<bundles_post_ra>
// kernel: tile.13
= control target key start
LH: loop header
LB: loop body
LE: loop exit
PB: predicated region body
PF: predicated region fallthrough
CT: control target
= control target key end

     0   :  { %s22_s0 = inlined_call_operand.vmem [shape: f32[8], index: 0, kind: input, shape index: {}]   ;;  %s23_s1 = inlined_call_operand.vmem [shape: f32[7,8], index: 1, kind: output, shape index: {}]  }
   0x1   :  { %v4_v0 = vld [vmem:[%s22_s0] ss:$0 sm:$0xff] }
   0x2   :  { %5 = vst [vmem:[%s23_s1] sm:$0xff] %v4_v0 }

// kernel: tile.14
= control target key start
LH: loop header
LB: loop body
LE: loop exit
PB: predicated region body
PF: predicated region fallthrough
CT: control target
= control target key end

     0   :  { %s59_s10 = smov 48   ;;  %s60_s11 = smov 32   ;;  %vm3_vm0 = vcmask 64512   ;;  %vm9_vm1 = vcmask 458112   ;;  %vm15_vm2 = vcmask 392512   ;;  %vm21_vm3 = vcmask 326912   ;;  %s99_s0 = inlined_call_operand.vmem [shape: f32[7,8], index: 0, kind: input, shape index: {}]   ;;  %s100_s1 = inlined_call_operand.vmem [shape: f32[1,56], index: 1, kind: output, shape index: {}]  }
   0x1   :  { %v47_v0 = vld [vmem:[%s99_s0 + $0x6] sm:$0x1]   ;;  %v49_v1 = vld [vmem:[%s99_s0 + $0x4] sm:$0x1]   ;;  %v51_v2 = vld [vmem:[%s99_s0 + $0x2] sm:$0x1]  }
   0x2   :  { %7 = vrot.lane.b32.xlu0 %v47_v0, %s59_s10  ;;  %19 = vrot.lane.b32.xlu1 %v49_v1, %s60_s11  ;;  %s61_s14 = smov 16   ;;  %v48_v3 = vld [vmem:[%s99_s0 + $0x5] sm:$0x1]   ;;  %v50_v4 = vld [vmem:[%s99_s0 + $0x3] sm:$0x1]   ;;  %s62_s21 = smov 40  }
   0x3   :  { %31 = vrot.lane.b32.xlu2 %v51_v2, %s61_s14  ;;  %v52_v5 = vld [vmem:[%s99_s0 + $0x1] sm:$0x1]   ;;  %s63_s22 = smov 24   ;;  %s64_s23 = smov 8   ;;  %v2_v6 = vld [vmem:[%s99_s0] sm:$0x1]  }
   0x4   :  { %4 = vst.msk [vmem:[#allocation0] sm:$0x1] %vm3_vm0, %v2_v6   ;;  %vm27_vm4 = vcmask 261312   ;;  %vm33_vm5 = vcmask 195712   ;;  %vm39_vm6 = vcmask 130112  }
   0xa   :  { %13 = vrot.lane.b32.xlu0 %v48_v3, %s62_s21  ;;  %25 = vrot.lane.b32.xlu1 %v50_v4, %s63_s22 }
   0xb   :  { %37 = vrot.lane.b32.xlu2 %v52_v5, %s64_s23 }
  0x5d   :  { %v32_v7 = vpop.permute.xlu2 %31  }
  0x65   :  { %v38_v8 = vpop.permute.xlu2 %37  }
  0x74   :  { %v8_v9 = vpop.permute.xlu0 %7   ;;  %v20_v10 = vpop.permute.xlu1 %19  }
  0x75   :  { %10 = vst.msk [vmem:[#allocation0] sm:$0x1] %vm9_vm1, %v8_v9  }
  0x7c   :  { %v14_v11 = vpop.permute.xlu0 %13   ;;  %v26_v12 = vpop.permute.xlu1 %25  }
  0x7d   :  { %16 = vst.msk [vmem:[#allocation0] sm:$0x1] %vm15_vm2, %v14_v11  }
  0x7e   :  { %22 = vst.msk [vmem:[#allocation0] sm:$0x1] %vm21_vm3, %v20_v10  }
  0x7f   :  { %28 = vst.msk [vmem:[#allocation0] sm:$0x1] %vm27_vm4, %v26_v12  }
  0x80   :  { %34 = vst.msk [vmem:[#allocation0] sm:$0x1] %vm33_vm5, %v32_v7  }
  0x81   :  { %40 = vst.msk [vmem:[#allocation0] sm:$0x1] %vm39_vm6, %v38_v8  }
  0x88   :  { %v43_v13 = vld [vmem:[#allocation0] sm:$0x1] }
  0x89   :  { %46 = vst [vmem:[%s100_s1] sm:$0x1] %v43_v13 }

// kernel: tile.18
= control target key start
LH: loop header
LB: loop body
LE: loop exit
PB: predicated region body
PF: predicated region fallthrough
CT: control target
= control target key end

     0   :  { %s22_s0 = inlined_call_operand.vmem [shape: f32[16], index: 0, kind: input, shape index: {}]   ;;  %s23_s1 = inlined_call_operand.vmem [shape: f32[2,16], index: 1, kind: output, shape index: {}]  }
   0x1   :  { %v4_v0 = vld [vmem:[%s22_s0] ss:$0 sm:$0xff] }
   0x2   :  { %5 = vst [vmem:[%s23_s1] sm:$0x3] %v4_v0 }

// kernel: tile.19
= control target key start
LH: loop header
LB: loop body
LE: loop exit
PB: predicated region body
PF: predicated region fallthrough
CT: control target
= control target key end

     0   :  { %vm7_vm0 = vcmask 130048   ;;  %vm13_vm1 = vcmask 261248   ;;  %s39_s0 = inlined_call_operand.vmem [shape: f32[2,16], index: 0, kind: input, shape index: {}]   ;;  %s40_s1 = inlined_call_operand.vmem [shape: f32[1,32], index: 1, kind: output, shape index: {}]  }
   0x1   :  { %v4_v0 = vld [vmem:[%s39_s0] sm:$0x3]  ;;  %s22_s0 = smov 16  }
   0x2   :  { %5 = vst [vmem:[#allocation1] sm:$0x3] %v4_v0 }
   0x9   :  { %v10_v1 = vld [vmem:[#allocation1 + $0x1] sm:$0x1]   ;;  %v6_v2 = vld [vmem:[#allocation1] sm:$0x1]  }
   0xa   :  { %11 = vrot.lane.b32.xlu0 %v10_v1, %s22_s0  ;;  %8 = vst.msk [vmem:[#allocation0] sm:$0x1] %vm7_vm0, %v6_v2  }
  0x7c   :  { %v12_v3 = vpop.permute.xlu0 %11  }
  0x7d   :  { %14 = vst.msk [vmem:[#allocation0] sm:$0x1] %vm13_vm1, %v12_v3  }
  0x84   :  { %v17_v4 = vld [vmem:[#allocation0] sm:$0x1] }
  0x85   :  { %20 = vst [vmem:[%s40_s1] sm:$0x1] %v17_v4 }

// kernel: _lambda_.1
= control target key start
LH: loop header
LB: loop body
LE: loop exit
PB: predicated region body
PF: predicated region fallthrough
CT: control target
= control target key end

     0   :  { %16 = vsyncpa [#allocation5], 0  ;;  %s1672_s0 = inlined_call_operand.vmem [shape: f32[2,16,64], index: 0, kind: input, shape index: {}]   ;;  %s1673_s1 = inlined_call_operand.vmem [shape: f32[3,64,112], index: 1, kind: input, shape index: {}]   ;;  %s1674_s2 = inlined_call_operand.vmem [shape: f32[1,56], index: 2, kind: input, shape index: {}]   ;;  %s1675_s3 = inlined_call_operand.vmem [shape: f32[2,7,14], index: 3, kind: input, shape index: {}]   ;;  %s1676_s4 = inlined_call_operand.vmem [shape: f32[2,112,56], index: 4, kind: input, shape index: {}]   ;;  %s1677_s5 = inlined_call_operand.vmem [shape: f32[3,56,80], index: 5, kind: input, shape index: {}]   ;;  %s1678_s6 = inlined_call_operand.vmem [shape: f32[1,32], index: 6, kind: input, shape index: {}]   ;;  %s1679_s7 = inlined_call_operand.vmem [shape: f32[2,2,5], index: 7, kind: input, shape index: {}]   ;;  %s1680_s8 = inlined_call_operand.vmem [shape: f32[2,80,32], index: 8, kind: input, shape index: {}]   ;;  %s1681_s9 = inlined_call_operand.vmem [shape: f32[2,32,10], index: 9, kind: input, shape index: {}]   ;;  %s1682_s10 = inlined_call_operand.vmem [shape: f32[1,10], index: 10, kind: input, shape index: {}]   ;;  %s1683_s11 = inlined_call_operand.hbm [shape: f32[2,1,10], index: 11, kind: output, shape index: {}]  }
   0x1   :  { %18 = vsyncpa [#allocation5 + $0x1], 0  ;;  %s1257_s17 = smov 0   ;;  %s1259_s18 = smov 0  }
   0x2   :  { %s1261_s19 = smov 0   ;;  %s1263_s20 = smov 0  }
   0x3 LB: > { %1685 = sst [smem:[#allocation7_spill]] %s1191_s19  ;;  %s1278_s21 = sadd.s32 4294967295, %s1195_s20   ;;  %s1195_s20 = sphi %s1263_s20, %s1693_s20   ;;  %s1191_s19 = sphi %s1261_s19, %s1690_s19   ;;  %s1187_s18 = sphi %s1259_s18, %s1692_s18   ;;  %s1183_s17 = sphi %s1257_s17, %s1691_s17  }
   0x4   : > { %s1000_s22 = sadd.s32 4294967294, %s1195_s20   ;;  %s1282_s23 = sadd.s32 1, %s1195_s20  }
   0x5   : > { %s267_s24 = sadd.s32 1, %s1191_s19  ;;  %s264_s25 = ssub.s32 %s1195_s20, %s1282_s23 }
   0x6   : > { %p277_p0 = scmp.ne.s32.totalorder %s1191_s19, %s1187_s18  ;;  %p265_p1 = scmp.eq.s32.totalorder %s264_s25, 0 }
   0x7   : > { %p278_p2 = scmp.eq.s32.totalorder %s1278_s21, 1  ;;  %p283_p3 = scmp.ne.s32.totalorder %s1187_s18, %s1183_s17 }
   0x8   : > { %p284_p4 = scmp.eq.s32.totalorder %s1000_s22, 1  ;;  %p1003_p7 = scmp.ge.s32.totalorder %s1195_s20, 1 }
   0x9   : > { %s1293_s26 = scalar_select %p265_p1, %s1191_s19, %s267_s24  }
   0xa   : > { %p1295_p5 = por %p278_p2, %p277_p0  ;;  %p1299_p6 = por %p284_p4, %p283_p3 }
   0xb   : > { %1686 = sst [smem:[#allocation8_spill]] %s1293_s26  ;;  %p340_p8 = scmp.lt.s32.totalorder %s1195_s20, 3 }
   0xd   : > { %p341_p9 = pnand %p1003_p7, %p340_p8 }
   0xe   : > { %p379_p10 = scmp.lt.s32.totalorder (!%p341_p9), %s1278_s21, 1  ;;  %s941_s30 = scalar_lea.hbm (!%p341_p9), %s1683_s11, %s1278_s21 }
   0xf   : > { %344 = sbr.rel (%p341_p9) target bundleno = 1032 (0x408), region = 64  ;;  %s1153_s26 = scalar_lea.hbm (!%p341_p9), %s1683_s11, 2 }
  0x14   : > { %v1025_v0 = vld [vmem:[%s1673_s1 + $0xb8] sm:$0xff]  ;;  %v1024_v1 = vld [vmem:[%s1673_s1 + $0xb0] sm:$0xff]  ;;  %v1023_v5 = vld [vmem:[%s1673_s1 + $0xa8] sm:$0xff]  ;;  %s380_s24 = scalar_select %p379_p10, %s1278_s21, 1  ;;  %vm405_vm0 = vcmask 523264   ;;  %vm511_vm1 = vcmask 1045504  }
  0x15   : > { %v1013_v2 = vld [vmem:[%s1673_s1 + $0x78] sm:$0xff]  ;;  %489 = vmatpush.msra.mxu2 %v1025_v0  ;;  %v1012_v4 = vld [vmem:[%s1673_s1 + $0x70] sm:$0xff]  ;;  %v1011_v7 = vld [vmem:[%s1673_s1 + $0x68] sm:$0xff]  ;;  %vm507_vm2 = vcmask 113664   ;;  %vm575_vm3 = vcmask 916480   ;;  %vm641_vm4 = vcmask 456704  }
  0x16   : > { %420 = vmatpush.msra.mxu0 %v1013_v2  ;;  %v393_v3 = vld [vmem:[%s1673_s1 + $0x38] sm:$0xff]  ;;  %v392_v6 = vld [vmem:[%s1673_s1 + $0x30] sm:$0xff]  ;;  %v391_v8 = vld [vmem:[%s1673_s1 + $0x28] sm:$0xff]  ;;  %s1091_s29 = sshll.u32 %s380_s24, 4  ;;  %vm660_vm5 = vcmask 457728   ;;  %vm745_vm6 = vcmask 1044480  }
  0x17   : > { %449 = vmatpush.msra.mxu1 %v393_v3  ;;  %490 = vmatpush.msra.mxu2 %v1024_v1  ;;  %v1022_v9 = vld [vmem:[%s1673_s1 + $0xa0] sm:$0xff]  ;;  %v1021_v12 = vld [vmem:[%s1673_s1 + $0x98] sm:$0xff]  ;;  %v1020_v15 = vld [vmem:[%s1673_s1 + $0x90] sm:$0xff]  ;;  %s383_s25 = scalar_lea.vmem %s1672_s0, %s1091_s29  ;;  %vm741_vm7 = vcmask 39936   ;;  %vm805_vm8 = vcmask 654336   ;;  %vm867_vm9 = vcmask 254976  }
  0x18   : > { %421 = vmatpush.msra.mxu0 %v1012_v4  ;;  %v1010_v10 = vld [vmem:[%s1673_s1 + $0x60] sm:$0xff]  ;;  %v1009_v13 = vld [vmem:[%s1673_s1 + $0x58] sm:$0xff]  ;;  %v1008_v16 = vld [vmem:[%s1673_s1 + $0x50] sm:$0xff]  ;;  %vm875_vm10 = vcmask 261120   ;;  %s377_s29 = sand.u32 1, %s1187_s18   ;;  %vm930_vm11 = vcmask 73728  }
  0x19   : > { %450 = vmatpush.msra.mxu1 %v392_v6  ;;  %491 = vmatpush.msra.mxu2 %v1023_v5  ;;  %v390_v11 = vld [vmem:[%s1673_s1 + $0x20] sm:$0xff]  ;;  %v389_v14 = vld [vmem:[%s1673_s1 + $0x18] sm:$0xff]  ;;  %v1019_v17 = vld [vmem:[%s1673_s1 + $0x88] sm:$0xff]  ;;  %s378_s13 = scalar_lea.vmem [#allocation4], %s377_s29  ;;  %s933_s15 = scalar_lea.sflag [#allocation5], %s377_s29 }
  0x1a   : > { %422 = vmatpush.msra.mxu0 %v1011_v7  ;;  %v388_v18 = vld [vmem:[%s1673_s1 + $0x10] sm:$0xff]  ;;  %v1007_v19 = vld [vmem:[%s1673_s1 + $0x48] sm:$0xff]  ;;  %v1018_v21 = vld [vmem:[%s1673_s1 + $0x80] sm:$0xff]  ;;  %s943_s14 = sshll.u32 %s378_s13, 4  ;;  %s944_s14 = int_to_ptr.vmem [resolvable:$true] %s943_s14 }
  0x1b   : > { %451 = vmatpush.msra.mxu1 %v391_v8  ;;  %492 = vmatpush.msra.mxu2 %v1022_v9  ;;  %v387_v20 = vld [vmem:[%s1673_s1 + $0x8] sm:$0xff]  ;;  %v1006_v22 = vld [vmem:[%s1673_s1 + $0x40] sm:$0xff]  ;;  %v1047_v30 = vld [vmem:[%s1676_s4 + $0xd8] sm:$0xff] }
  0x1c   : > { %423 = vmatpush.msra.mxu0 %v1010_v10  ;;  %v464_v23 = vld [vmem:[%s383_s25 + $0x2] sm:$0xff]  ;;  %v465_v27 = vld [vmem:[%s383_s25 + $0xa] sm:$0x3f]  ;;  %v1046_v31 = vld [vmem:[%s1676_s4 + $0xd0] sm:$0xff] }
  0x1d   : > { %452 = vmatpush.msra.mxu1 %v390_v11  ;;  %493 = vmatpush.msra.mxu2 %v1021_v12  ;;  %v386_v24 = vld [vmem:[%s1673_s1] sm:$0xff]  ;;  %v395_v28 = vld [vmem:[%s383_s25 + $0x9] sm:$0x3f]  ;;  %v1043_v36 = vld [vmem:[%s1676_s4 + $0xb8] sm:$0xff] }
  0x1e   : > { %424 = vmatpush.msra.mxu0 %v1009_v13  ;;  %v394_v25 = vld [vmem:[%s383_s25 + $0x1] sm:$0xff]  ;;  %v1042_v37 = vld [vmem:[%s1676_s4 + $0xb0] sm:$0xff]  ;;  %v572_v52 = vld [vmem:[%s1676_s4 + $0x58] sm:$0xff] }
  0x1f   : > { %453 = vmatpush.msra.mxu1 %v389_v14  ;;  %494 = vmatpush.msra.mxu2 %v1020_v15  ;;  %v384_v26 = vld [vmem:[%s383_s25] sm:$0xff]  ;;  %v385_v29 = vld [vmem:[%s383_s25 + $0x8] sm:$0x3f]  ;;  %v571_v53 = vld [vmem:[%s1676_s4 + $0x50] sm:$0xff]  ;;  %s945_s25 = sshll.u32 %s941_s30, 4  ;;  %s946_s25 = int_to_ptr.hbm [resolvable:$true] %s945_s25 }
  0x20   : > { %425 = vmatpush.msra.mxu0 %v1008_v16  ;;  %v1045_v32 = vld [vmem:[%s1676_s4 + $0xc8] sm:$0xff]  ;;  %v1044_v33 = vld [vmem:[%s1676_s4 + $0xc0] sm:$0xff]  ;;  %v568_v56 = vld [vmem:[%s1676_s4 + $0x38] sm:$0xff]  ;;  %s1147_s16 = sshra.s32 %s946_s25, 4  ;;  %s1148_s16 = int_to_ptr.hbm [resolvable:$true] %s1147_s16 }
  0x21   : > { %454 = vmatpush.msra.mxu1 %v388_v18  ;;  %495 = vmatpush.msra.mxu2 %v1019_v17  ;;  %v1041_v39 = vld [vmem:[%s1676_s4 + $0xa8] sm:$0xff]  ;;  %v1040_v40 = vld [vmem:[%s1676_s4 + $0xa0] sm:$0xff]  ;;  %v567_v57 = vld [vmem:[%s1676_s4 + $0x30] sm:$0xff]  ;;  %s1149_s21 = scalar_lea.hbm %s1148_s16, 1  ;;  %p1154_p0 = scmp.lt.s32.totalorder %s1148_s16, %s1683_s11 }
  0x22   : > { %426 = vmatpush.msra.mxu0 %v1007_v19  ;;  %v506_v48 = vld [vmem:[%s1675_s3] sm:$0x7f]  ;;  %v574_v49 = vld [vmem:[%s1676_s4 + $0x68] sm:$0xff]  ;;  %v1039_v59 = vld [vmem:[%s1676_s4 + $0x98] sm:$0xff]  ;;  %p1150_p11 = scmp.ne.s32.totalorder %s1148_s16, %s1149_s21  ;;  %p1155_p1 = scmp.lt.s32.totalorder %s1153_s26, %s1149_s21 }
  0x23   : > { %455 = vmatpush.msra.mxu1 %v387_v20  ;;  %496 = vmatpush.msra.mxu2 %v1018_v21  ;;  %v573_v50 = vld [vmem:[%s1676_s4 + $0x60] sm:$0xff]  ;;  %v1030_v51 = vld [vmem:[%s1675_s3 + $0x8] sm:$0x7f]  ;;  %v1038_v61 = vld [vmem:[%s1676_s4 + $0x90] sm:$0xff] }
  0x24   : > { %427 = vmatpush.msra.mxu0 %v1006_v22  ;;  %1026 = vmatmul.msk.f32.vlgmr.msra.gmra.mxu2 %vm405_vm0, %v464_v23  ;;  %v570_v54 = vld [vmem:[%s1676_s4 + $0x48] sm:$0xff]  ;;  %v569_v55 = vld [vmem:[%s1676_s4 + $0x40] sm:$0xff]  ;;  %v564_v62 = vld [vmem:[%s1676_s4 + $0x18] sm:$0xff]  ;;  %p1151_p12 = pnand %p1150_p11, %p1295_p5  ;;  %p1156_p2 = por %p1155_p1, %p1154_p0 }
  0x25   : > { %456 = vmatpush.msra.mxu1 %v386_v24  ;;  %1014 = vmatmul.msk.f32.vlgmr.msra.gmra.mxu0 %vm405_vm0, %v394_v25  ;;  %v566_v58 = vld [vmem:[%s1676_s4 + $0x28] sm:$0xff]  ;;  %v565_v60 = vld [vmem:[%s1676_s4 + $0x20] sm:$0xff]  ;;  %v563_v0 = vld [vmem:[%s1676_s4 + $0x10] sm:$0xff] }
  0x26   : > { %1016 = vmatmul.msk.f32.vlgmr.msra.gmra.mxu1 %vm405_vm0, %v384_v26  ;;  %616 = vmatpush.msrb.mxu0 %v1047_v30  ;;  %v1037_v63 = vld [vmem:[%s1676_s4 + $0x88] sm:$0xff]  ;;  %v1036_v1 = vld [vmem:[%s1676_s4 + $0x80] sm:$0xff]  ;;  %v1035_v3 = vld [vmem:[%s1676_s4 + $0x78] sm:$0xff]  ;;  %p1152_p13 = pneg %p1151_p12 }
  0x27   : > { %v562_v2 = vld [vmem:[%s1676_s4 + $0x8] sm:$0xff]  ;;  %v561_v4 = vld [vmem:[%s1676_s4] sm:$0xff]  ;;  %v1034_v5 = vld [vmem:[%s1676_s4 + $0x70] sm:$0xff] }
  0x28   : > { %617 = vmatpush.msrb.mxu0 %v1046_v31  ;;  %v1055_v9 = vld [vmem:[%s1677_s5 + $0x68] sm:$0xff]  ;;  %v1054_v10 = vld [vmem:[%s1677_s5 + $0x60] sm:$0xff]  ;;  %v1053_v11 = vld [vmem:[%s1677_s5 + $0x58] sm:$0xff]  ;;  %p1157_p3 = pnand %p1156_p2, %p1152_p13 }
  0x29   : > { %673 = vmatpush.msrb.mxu1 %v1055_v9  ;;  %v650_v12 = vld [vmem:[%s1677_s5 + $0x30] sm:$0xff]  ;;  %v649_v14 = vld [vmem:[%s1677_s5 + $0x28] sm:$0xff]  ;;  %v648_v16 = vld [vmem:[%s1677_s5 + $0x20] sm:$0xff] }
  0x2a   : > { %618 = vmatpush.msrb.mxu0 %v1045_v32  ;;  %696 = vmatpush.msrb.mxu2 %v650_v12  ;;  %v1052_v13 = vld [vmem:[%s1677_s5 + $0x50] sm:$0xff]  ;;  %v1051_v15 = vld [vmem:[%s1677_s5 + $0x48] sm:$0xff]  ;;  %v1050_v17 = vld [vmem:[%s1677_s5 + $0x40] sm:$0xff] }
  0x2b   : > { %674 = vmatpush.msrb.mxu1 %v1054_v10  ;;  %v647_v18 = vld [vmem:[%s1677_s5 + $0x18] sm:$0xff]  ;;  %v646_v20 = vld [vmem:[%s1677_s5 + $0x10] sm:$0xff]  ;;  %v1064_v21 = vld [vmem:[%s1677_s5 + $0xa0] sm:$0xff] }
  0x2c   : > { %1027 = vmatmul.msk.f32.gmra.mxu2 %vm405_vm0, %v465_v27  ;;  %619 = vmatpush.msrb.mxu0 %v1044_v33  ;;  %v1049_v19 = vld [vmem:[%s1677_s5 + $0x38] sm:$0xff]  ;;  %v645_v22 = vld [vmem:[%s1677_s5 + $0x8] sm:$0xff]  ;;  %v644_v24 = vld [vmem:[%s1677_s5] sm:$0xff] }
  0x2d   : > { %1015 = vmatmul.msk.f32.gmra.mxu0 %vm405_vm0, %v395_v28  ;;  %675 = vmatpush.msrb.mxu1 %v1053_v11  ;;  %v1063_v23 = vld [vmem:[%s1677_s5 + $0x98] sm:$0xff]  ;;  %v1062_v25 = vld [vmem:[%s1677_s5 + $0x90] sm:$0xff]  ;;  %v1061_v26 = vld [vmem:[%s1677_s5 + $0x88] sm:$0xff] }
  0x2e   : > { %1017 = vmatmul.msk.f32.gmra.mxu1 %vm405_vm0, %v385_v29  ;;  %620 = vmatpush.msrb.mxu0 %v1043_v36  ;;  %v1060_v27 = vld [vmem:[%s1677_s5 + $0x80] sm:$0xff]  ;;  %v1059_v28 = vld [vmem:[%s1677_s5 + $0x78] sm:$0xff]  ;;  %v1058_v29 = vld [vmem:[%s1677_s5 + $0x70] sm:$0xff] }
  0x2f   : > { %676 = vmatpush.msrb.mxu1 %v1052_v13  ;;  %697 = vmatpush.msrb.mxu2 %v649_v14  ;;  %v1131_v30 = vld [vmem:[%s1674_s2] ss:$0 sm:$0xff]  ;;  %v872_v9 = vld [vmem:[%s1681_s9 + $0x8] sm:$0xff] }
  0x30   : > { %621 = vmatpush.msrb.mxu0 %v1042_v37  ;;  %v1085_v10 = vld [vmem:[%s1681_s9 + $0x28] sm:$0xff]  ;;  %v871_v11 = vld [vmem:[%s1681_s9] sm:$0xff] }
  0x31   : > { %677 = vmatpush.msrb.mxu1 %v1051_v15  ;;  %698 = vmatpush.msrb.mxu2 %v648_v16  ;;  %v1084_v12 = vld [vmem:[%s1681_s9 + $0x20] sm:$0xff] }
  0x32   : > { %622 = vmatpush.msrb.mxu0 %v1041_v39  ;;  %v804_v39 = vld [vmem:[%s1680_s8 + $0x48] sm:$0xff]  ;;  %v1132_v13 = vld [vmem:[%s1678_s6] ss:$0 sm:$0xff] }
  0x33   : > { %678 = vmatpush.msrb.mxu1 %v1050_v17  ;;  %699 = vmatpush.msrb.mxu2 %v647_v18 }
  0x34   : > { %623 = vmatpush.msrb.mxu0 %v1040_v40  ;;  %v1081_v40 = vld [vmem:[%s1680_s8 + $0x98] sm:$0xff] }
  0x35   : > { %679 = vmatpush.msrb.mxu1 %v1049_v19  ;;  %700 = vmatpush.msrb.mxu2 %v646_v20 }
  0x36   : > { %624 = vmatpush.msrb.mxu0 %v1039_v59  ;;  %v1075_v59 = vld [vmem:[%s1680_s8 + $0x68] sm:$0xff] }
  0x37   : > { %728 = vmatpush.msra.mxu1 %v1064_v21  ;;  %701 = vmatpush.msrb.mxu2 %v645_v22  ;;  %v869_v21 = vld [vmem:[%s1682_s10] sm:$0x1] }
  0x38   : > { %625 = vmatpush.msrb.mxu0 %v1038_v61  ;;  %v1074_v61 = vld [vmem:[%s1680_s8 + $0x60] sm:$0xff] }
  0x39   : > { %729 = vmatpush.msra.mxu1 %v1063_v23  ;;  %702 = vmatpush.msrb.mxu2 %v644_v24 }
  0x3a   : > { %626 = vmatpush.msrb.mxu0 %v1037_v63  ;;  %v1073_v63 = vld [vmem:[%s1680_s8 + $0x58] sm:$0xff] }
  0x3b   : > { %730 = vmatpush.msra.mxu1 %v1062_v25 }
  0x3c   : > { %627 = vmatpush.msrb.mxu0 %v1036_v1  ;;  %v1072_v1 = vld [vmem:[%s1680_s8 + $0x50] sm:$0xff] }
  0x3d   : > { %731 = vmatpush.msra.mxu1 %v1061_v26 }
  0x3e   : > { %628 = vmatpush.msrb.mxu0 %v1035_v3 }
  0x3f   : > { %732 = vmatpush.msra.mxu1 %v1060_v27 }
  0x40   : > { %629 = vmatpush.msrb.mxu0 %v1034_v5  ;;  %v874_v5 = vld [vmem:[%s1681_s9 + $0x18] sm:$0xff] }
  0x41   : > { %733 = vmatpush.msra.mxu1 %v1059_v28 }
  0x42   : > { %846 = vmatpush.msra.mxu0 %v1081_v40 }
  0x43   : > { %734 = vmatpush.msra.mxu1 %v1058_v29 }
  0xa2   : > { %v429_v34 = vpop.f32.mrf.mxu0 }
  0xa3   : > { %v458_v35 = vpop.f32.mrf.mxu1 }
  0xa4   : > { %v459_v44 = vadd.f32 %v458_v35, %v429_v34 }
  0xa7   : > { %v498_v38 = vpop.f32.mrf.mxu2 }
  0xa8   : > { %v504_v47 = vadd.f32 %v498_v38, %v459_v44  ;;  %v1079_v44 = vld [vmem:[%s1680_s8 + $0x88] sm:$0xff] }
  0xaa   : > { %v432_v41 = vpop.f32.mrf.mxu0 }
  0xab   : > { %v461_v42 = vpop.f32.mrf.mxu1 }
  0xac   : > { %v462_v43 = vadd.f32 %v461_v42, %v432_v41  ;;  %v803_v41 = vld [vmem:[%s1680_s8 + $0x40] sm:$0xff]  ;;  %v1080_v42 = vld [vmem:[%s1680_s8 + $0x90] sm:$0xff] }
  0xad   : > { %847 = vmatpush.msra.mxu0 %v1080_v42 }
  0xaf   : > { %v501_v45 = vpop.f32.mrf.mxu2  ;;  %848 = vmatpush.msra.mxu0 %v1079_v44 }
  0xb0   : > { %v505_v46 = vadd.f32 %v501_v45, %v462_v43  ;;  %v802_v43 = vld [vmem:[%s1680_s8 + $0x38] sm:$0xff]  ;;  %v801_v45 = vld [vmem:[%s1680_s8 + $0x30] sm:$0xff] }
  0xb2   : > { %1028 = vmatpush.msk.msra.mxu3 %vm511_vm1, %v505_v46 }
  0xb4   : > { %530 = vmatpush.msra.mxu3 %v504_v47 }
  0xb5   : > { %1029 = vmatmul.msk.f32.vlgmr.msra.gmra.mxu3 %vm507_vm2, %v506_v48 }
  0xb6   : > { %1031 = vmatpush.msk.msrb.mxu3 %vm511_vm1, %v505_v46  ;;  %v1078_v46 = vld [vmem:[%s1680_s8 + $0x80] sm:$0xff] }
  0xb7   : > { %849 = vmatpush.msra.mxu0 %v1078_v46 }
  0xb8   : > { %555 = vmatpush.msrb.mxu3 %v504_v47 }
  0xba   : > { %581 = vmatpush.msra.mxu3 %v574_v49 }
  0xbc   : > { %582 = vmatpush.msra.mxu3 %v573_v50 }
  0xbd   : > { %1032 = vmatmul.msk.f32.vlgmr.msrb.gmra.mxu3 %vm507_vm2, %v1030_v51 }
  0xbe   : > { %583 = vmatpush.msra.mxu3 %v572_v52  ;;  %v740_v52 = vld [vmem:[%s1679_s7] sm:$0x3] }
  0xc0   : > { %584 = vmatpush.msra.mxu3 %v571_v53  ;;  %v1068_v53 = vld [vmem:[%s1679_s7 + $0x2] sm:$0x3] }
  0xc2   : > { %585 = vmatpush.msra.mxu3 %v570_v54  ;;  %v800_v54 = vld [vmem:[%s1680_s8 + $0x28] sm:$0xff] }
  0xc4   : > { %586 = vmatpush.msra.mxu3 %v569_v55  ;;  %v1077_v55 = vld [vmem:[%s1680_s8 + $0x78] sm:$0xff] }
  0xc5   : > { %850 = vmatpush.msra.mxu0 %v1077_v55 }
  0xc6   : > { %587 = vmatpush.msra.mxu3 %v568_v56  ;;  %v799_v56 = vld [vmem:[%s1680_s8 + $0x20] sm:$0xff] }
  0xc8   : > { %588 = vmatpush.msra.mxu3 %v567_v57  ;;  %v1076_v57 = vld [vmem:[%s1680_s8 + $0x70] sm:$0xff] }
  0xc9   : > { %851 = vmatpush.msra.mxu0 %v1076_v57 }
  0xca   : > { %589 = vmatpush.msra.mxu3 %v566_v58  ;;  %v798_v58 = vld [vmem:[%s1680_s8 + $0x18] sm:$0xff] }
  0xcb   : > { %852 = vmatpush.msra.mxu0 %v1075_v59 }
  0xcc   : > { %590 = vmatpush.msra.mxu3 %v565_v60  ;;  %v797_v60 = vld [vmem:[%s1680_s8 + $0x10] sm:$0xff] }
  0xcd   : > { %853 = vmatpush.msra.mxu0 %v1074_v61 }
  0xce   : > { %591 = vmatpush.msra.mxu3 %v564_v62  ;;  %v796_v62 = vld [vmem:[%s1680_s8 + $0x8] sm:$0xff] }
  0xcf   : > { %854 = vmatpush.msra.mxu0 %v1073_v63 }
  0xd0   : > { %592 = vmatpush.msra.mxu3 %v563_v0  ;;  %v795_v0 = vld [vmem:[%s1680_s8] sm:$0xff] }
  0xd1   : > { %855 = vmatpush.msra.mxu0 %v1072_v1 }
  0xd2   : > { %593 = vmatpush.msra.mxu3 %v562_v2 }
  0xd4   : > { %594 = vmatpush.msra.mxu3 %v561_v4 }
  0xd6   : > { %815 = vmatpush.msrb.mxu3 %v804_v39 }
  0xd8   : > { %816 = vmatpush.msrb.mxu3 %v803_v41 }
  0xda   : > { %817 = vmatpush.msrb.mxu3 %v802_v43 }
  0xdc   : > { %818 = vmatpush.msrb.mxu3 %v801_v45 }
  0xde   : > { %819 = vmatpush.msrb.mxu3 %v800_v54 }
  0xe0   : > { %820 = vmatpush.msrb.mxu3 %v799_v56 }
  0xe2   : > { %821 = vmatpush.msrb.mxu3 %v798_v58 }
  0xe4   : > { %822 = vmatpush.msrb.mxu3 %v797_v60 }
  0xe6   : > { %823 = vmatpush.msrb.mxu3 %v796_v62 }
  0xe8   : > { %824 = vmatpush.msrb.mxu3 %v795_v0 }
 0x138   : > { %v532_v6 = vpop.f32.mrf.mxu3 }
 0x140   : > { %v557_v7 = vpop.f32.mrf.mxu3 }
 0x141   : > { %v560_v8 = vmax.f32 %v532_v6, %v557_v7  ;;  %v1087_v6 = vld [vmem:[%s1681_s9 + $0x38] sm:$0xff]  ;;  %v873_v7 = vld [vmem:[%s1681_s9 + $0x10] sm:$0xff] }
 0x143   : > { %1033 = vmatmul.msk.f32.vlgmr.msra.gmra.mxu3 %vm575_vm3, %v560_v8  ;;  %1048 = vmatmul.msk.f32.vlgmr.msrb.gmra.mxu0 %vm575_vm3, %v560_v8  ;;  %v1086_v8 = vld [vmem:[%s1681_s9 + $0x30] sm:$0xff] }
 0x1c0   : > { %v631_v31 = vpop.f32.mrf.mxu0 }
 0x1c6   : > { %v596_v32 = vpop.f32.mrf.mxu3 }
 0x1c7   : > { %v634_v33 = vmax.f32 %v596_v32, %v631_v31 }
 0x1c9   : > { %v639_v34 = vadd.f32 %v1131_v30, %v634_v33 }
 0x1cb   : > { %v640_v35 = vmax.f32 %v639_v34, 0.0 }
 0x1cd   : > { %642 = vst.msk [vmem:[#allocation2] sm:$0x7f] %vm641_vm4, %v640_v35 }
 0x1d4   : > { %v651_v36 = vld [vmem:[#allocation2 + $0x1] sm:$0x1f] }
 0x1d5   : > { %v643_v37 = vld [vmem:[#allocation2] sm:$0x1f]  ;;  %1056 = vmatmul.msk.f32.vlgmr.msrb.gmra.mxu1 %vm660_vm5, %v651_v36 }
 0x1d6   : > { %1057 = vmatmul.msk.f32.vlgmr.msrb.gmra.mxu2 %vm660_vm5, %v643_v37  ;;  %v707_v38 = vld [vmem:[#allocation2 + $0x2] sm:$0x1f]  ;;  %891 = vmatpush.msrb.mxu1 %v874_v5 }
 0x1d8   : > { %892 = vmatpush.msrb.mxu1 %v873_v7 }
 0x1da   : > { %893 = vmatpush.msrb.mxu1 %v872_v9 }
 0x1dc   : > { %894 = vmatpush.msrb.mxu1 %v871_v11 }
 0x1dd   : > { %1065 = vmatmul.msk.f32.vlgmr.msra.gmra.mxu1 %vm660_vm5, %v707_v38 }
 0x252   : > { %v681_v47 = vpop.f32.mrf.mxu1 }
 0x259   : > { %v704_v48 = vpop.f32.mrf.mxu2 }
 0x25a   : > { %v705_v49 = vadd.f32 %v704_v48, %v681_v47  ;;  %v736_v50 = vpop.f32.mrf.mxu1 }
 0x25c   : > { %v739_v51 = vadd.f32 %v736_v50, %v705_v49 }
 0x25e   : > { %1066 = vmatpush.msk.msra.mxu2 %vm745_vm6, %v739_v51 }
 0x25f   : > { %1067 = vmatmul.msk.f32.vlgmr.msra.gmra.mxu2 %vm741_vm7, %v740_v52 }
 0x260   : > { %1069 = vmatpush.msk.msrb.mxu2 %vm745_vm6, %v739_v51 }
 0x262   : > { %921 = vmatpush.msra.mxu2 %v1087_v6 }
 0x264   : > { %922 = vmatpush.msra.mxu2 %v1086_v8 }
 0x266   : > { %923 = vmatpush.msra.mxu2 %v1085_v10 }
 0x267   : > { %1070 = vmatmul.msk.f32.vlgmr.msrb.gmra.mxu2 %vm741_vm7, %v1068_v53 }
 0x268   : > { %924 = vmatpush.msra.mxu2 %v1084_v12 }
 0x2e2   : > { %v766_v2 = vpop.f32.mrf.mxu2 }
 0x2ea   : > { %v791_v3 = vpop.f32.mrf.mxu2 }
 0x2eb   : > { %v794_v4 = vmax.f32 %v766_v2, %v791_v3 }
 0x2ed   : > { %1071 = vmatmul.msk.f32.vlgmr.msrb.gmra.mxu3 %vm805_vm8, %v794_v4  ;;  %1082 = vmatmul.msk.f32.vlgmr.msra.gmra.mxu0 %vm805_vm8, %v794_v4 }
 0x36a   : > { %v857_v14 = vpop.f32.mrf.mxu0 }
 0x370   : > { %v826_v15 = vpop.f32.mrf.mxu3 }
 0x371   : > { %v860_v16 = vmax.f32 %v826_v15, %v857_v14 }
 0x373   : > { %v865_v17 = vadd.f32 %v1132_v13, %v860_v16 }
 0x375   : > { %v866_v18 = vmax.f32 %v865_v17, 0.0 }
 0x377   : > { %868 = vst.msk [vmem:[#allocation3] sm:$0x3] %vm867_vm9, %v866_v18 }
 0x37e   : > { %v870_v19 = vld [vmem:[#allocation3] sm:$0x1]  ;;  %v900_v20 = vld [vmem:[#allocation3 + $0x1] sm:$0x1] }
 0x37f   : > { %1083 = vmatmul.msk.f32.vlgmr.msrb.gmra.mxu1 %vm875_vm10, %v870_v19  ;;  %1088 = vmatmul.msk.f32.vlgmr.msra.gmra.mxu2 %vm875_vm10, %v900_v20 }
 0x3fc   : > { %v896_v22 = vpop.f32.mrf.mxu1 }
 0x3fd   : > { %v899_v23 = vadd.f32 %v896_v22, %v869_v21 }
 0x402   : > { %v926_v24 = vpop.f32.mrf.mxu2 }
 0x403   : > { %v929_v25 = vadd.f32 %v926_v24, %v899_v23 }
 0x405   : > { %931 = vst.msk [vmem:[%s378_s13] sm:$0x1] %vm930_vm11, %v929_v25 }
 0x406   : > { %1160 = shalt.err (!%p1157_p3)
}
 0x407   : > { %1092 = dma.vmem_to_hbm [thread:$0]  (%p1295_p5), %s944_s14, 16, %s946_s25, %s933_s15  }
 0x408 PF: > { %p1098_p4 = scmp.ge.s32.totalorder %s1195_s20, 2  ;;  %s957_s29 = sand.u32 1, %s1183_s17  }
 0x409   : > { %s958_s19 = scalar_lea.sflag [#allocation5], %s957_s29 }
 0x40a   : > { %p1095_p7 = pnand %p1098_p4, %p1299_p6 }
 0x40c   : > { %p1096_p8 = pneg %p1095_p7 }
 0x40e   : > { %1178 = dma.done.wait (%p1096_p8), %s958_s19, 16  }
 0x40f   : > { %1180 = vsyncadd (%p1096_p8), %s958_s19, 4294967280  ;;  %s1689_s13 = sld [smem:[#allocation7_spill]]  ;;  %p21_p9 = scmp.ge.s32.totalorder %s1282_s23, 4  }
 0x410   : > { %s1690_s19 = sld [smem:[#allocation8_spill]]  ;;  %s1691_s17 = smov %s1187_s18 }
 0x411   : > { %s1693_s20 = smov %s1282_s23  ;;  %23 = sbr.rel (!%p21_p9) target bundleno = 3 (0x3), region = 108 }
 0x415   : > { %s1692_s18 = smov %s1689_s13 }
 0x416   :  { %963 = vsyncpa [#allocation5], 1 }
 0x417   :  { %965 = vsyncpa [#allocation5 + $0x1], 1 }

</bundles_post_ra>
